<compile_context>
chip_gen: v7x
topology: tpu7x:2x2x1
jax: 0.10.0
libtpu: 0.0.40
codegen_flags: <defaults>
</compile_context>

<pallas_src>
import math
import numpy as np
import jax
import jax.numpy as jnp
from jax import lax
from jax.experimental import pallas as pl
from jax.experimental.pallas import tpu as pltpu


# ----------------------------- helpers --------------------------------------
def _lane_dense_2d(x):
    """Flatten to 2-D with a lane-dense (multiple-of-128) last dim if possible."""
    total = int(np.prod(x.shape))
    for cand in (512, 1024, 2048, 256, 128):
        if total % cand == 0:
            return x.reshape(total // cand, cand)
    return x.reshape(-1, x.shape[-1])


def _row_tile(rows, cols, itemsize, target_bytes=2 * 1024 * 1024):
    """Rows per grid step: multiple of 8, tile <= ~2 MiB (fits v7x scoped VMEM
    with double-buffered in+out blocks)."""
    if rows <= 8:
        return rows
    per_row = max(cols * itemsize, 1)
    t = min(rows, max(8, target_bytes // per_row))
    return int(max(8, (t // 8) * 8))


def _divisor_tile(total, target=256, step=8):
    """Largest multiple-of-8 divisor of `total` that is <= target (no ragged blocks)."""
    best = step
    t = step
    limit = min(total, target)
    while t <= limit:
        if total % t == 0:
            best = t
        t += step
    return best


# ----------------------------- Identity -------------------------------------
def identity_forward(encoded_and_cover):
    enc, cover = encoded_and_cover
    # Identity is a pure pass-through: no Pallas kernel (a copy kernel would
    # only add 2x tensor bytes of HBM traffic for zero work).
    return [enc, cover]


# --------------------------- Quantization -----------------------------------
_QUANT_N = 10  # number of Fourier terms in the differentiable rounding


def _fourier_round(t):
    """t + sum_{k=1..N} ((-1)^k / (pi k)) * sin(2*pi*k*t), via the multiple-
    angle recurrence sin(k*th) = 2*cos(th)*sin((k-1)th) - sin((k-2)th)
    (1 sin + 1 cos on the EUP, the rest is VPU FMA filler)."""
    theta = (2.0 * math.pi) * t
    sin1 = jnp.sin(theta)
    cos1 = jnp.cos(theta)
    two_cos = 2.0 * cos1
    sin_km2 = jnp.zeros_like(sin1)                    # sin(0*theta)
    sin_km1 = sin1                                    # sin(1*theta)
    z = (-1.0 / math.pi) * sin1                       # k = 1 term
    for k in range(2, _QUANT_N + 1):
        sin_k = two_cos * sin_km1 - sin_km2
        z = z + (((-1.0) ** k) / (math.pi * k)) * sin_k
        sin_km2 = sin_km1
        sin_km1 = sin_k
    return t + z


def _make_quant_stats_kernel(rows, tile):
    """Pass B: per-tile partial min/max of r = fourier_round((x-x_min)*s).
    Only tiny (8, cols) stat blocks are written to HBM; r itself is never
    materialized."""
    ragged = (rows % tile) != 0

    def kernel(p_ref, x_ref, mn_ref, mx_ref):
        # p_ref (SMEM): [x_min, 255/(x_max - x_min)]
        t = (x_ref[...] - p_ref[0]) * p_ref[1]
        r = _fourier_round(t)
        if ragged:
            # Last grid block may be padded; mask padded rows out of the stats.
            base = pl.program_id(0) * tile
            row_ids = lax.broadcasted_iota(jnp.int32, r.shape, 0) + base
            valid = row_ids < rows
            r_mn = jnp.where(valid, r, jnp.inf)
            r_mx = jnp.where(valid, r, -jnp.inf)
        else:
            r_mn = r
            r_mx = r
        mn_ref[...] = jnp.broadcast_to(
            jnp.min(r_mn, axis=0, keepdims=True), mn_ref.shape).astype(jnp.float32)
        mx_ref[...] = jnp.broadcast_to(
            jnp.max(r_mx, axis=0, keepdims=True), mx_ref.shape).astype(jnp.float32)

    return kernel


def _quant_out_kernel(p_ref, x_ref, o_ref):
    # Pass C: recompute r (cheaper than a full HBM round-trip of r) and apply
    # the fused affine rescale out = r*a + b.
    # p_ref (SMEM): [x_min, 255/x_rng, a = x_rng/r_rng, b = x_min - r_min*a]
    t = (x_ref[...] - p_ref[0]) * p_ref[1]
    r = _fourier_round(t)
    o_ref[...] = (r * p_ref[2] + p_ref[3]).astype(o_ref.dtype)


def quantization_forward(encoded_and_cover):
    enc, cover = encoded_and_cover
    x2d = _lane_dense_2d(enc)
    rows, cols = x2d.shape
    tile = _row_tile(rows, cols, x2d.dtype.itemsize)
    nt = (rows + tile - 1) // tile
    grid = (nt,)
    blk = pl.BlockSpec((tile, cols), lambda i: (i, 0))
    stat_blk = pl.BlockSpec((8, cols), lambda i: (i, 0))
    smem = pl.BlockSpec(memory_space=pltpu.MemorySpace.SMEM)
    cparams = pltpu.CompilerParams(dimension_semantics=("parallel",))

    # Pass A: global min/max of x (XLA fuses both reductions into one HBM read).
    x_min = jnp.min(enc)
    x_max = jnp.max(enc)
    x_rng = x_max - x_min
    safe_x = jnp.where(x_rng == 0, jnp.ones_like(x_rng), x_rng)  # guard /0
    s1 = 255.0 / safe_x
    p1 = jnp.stack([x_min, s1]).astype(jnp.float32)

    # Pass B: per-tile partial min/max of the fourier-rounded tensor.
    mn_part, mx_part = pl.pallas_call(
        _make_quant_stats_kernel(rows, tile),
        out_shape=(jax.ShapeDtypeStruct((nt * 8, cols), jnp.float32),
                   jax.ShapeDtypeStruct((nt * 8, cols), jnp.float32)),
        grid=grid,
        in_specs=[smem, blk],
        out_specs=[stat_blk, stat_blk],
        compiler_params=cparams,
    )(p1, x2d)

    r_min = jnp.min(mn_part)
    r_max = jnp.max(mx_part)
    r_rng = r_max - r_min
    safe_r = jnp.where(r_rng == 0, jnp.ones_like(r_rng), r_rng)  # guard /0
    a = x_rng / safe_r
    b = x_min - r_min * a
    p2 = jnp.stack([x_min, s1, a, b]).astype(jnp.float32)

    # Pass C: recompute + fused affine rescale, lane-dense stores.
    out = pl.pallas_call(
        _quant_out_kernel,
        out_shape=jax.ShapeDtypeStruct(x2d.shape, x2d.dtype),
        grid=grid,
        in_specs=[smem, blk],
        out_specs=blk,
        compiler_params=cparams,
    )(p2, x2d)
    return [out.reshape(enc.shape), cover]


# -------------------------- JpegCompression ---------------------------------
def _dct8_matrix():
    d = np.zeros((8, 8), dtype=np.float32)
    for i in range(8):
        for j in range(8):
            c = math.sqrt(1.0 / 8.0) if i == 0 else math.sqrt(2.0 / 8.0)
            d[i, j] = c * math.cos((2 * j + 1) * i * math.pi / 16.0)
    return d


def _jpeg_keep_mask(keep=5):
    # keep only low-frequency DCT coefficients (i + j < keep)
    ii, jj = np.meshgrid(np.arange(8), np.arange(8), indexing="ij")
    return ((ii + jj) < keep).astype(np.float32)


def _blockdiag_dct(n_copies):
    d = _dct8_matrix()
    out = np.zeros((8 * n_copies, 8 * n_copies), dtype=np.float32)
    for i in range(n_copies):
        out[8 * i:8 * i + 8, 8 * i:8 * i + 8] = d
    return out


def _jpeg_kernel(x_ref, bh_ref, bw_ref, m_ref, o_ref):
    # x: (Hb, W) slab of image rows; bh/bw: block-diagonal DCT operators.
    # out block = D^T (M * (D X D^T)) D per 8x8 block, done with 4 full-width
    # MXU matmuls + one elementwise mask (no per-8x8 einsums, no reshuffle).
    x = x_ref[...]
    bh = bh_ref[...]
    bw = bw_ref[...]
    c = jnp.dot(bh, x, preferred_element_type=jnp.float32)          # row DCT
    c = lax.dot_general(c, bw, (((1,), (1,)), ((), ())),
                        preferred_element_type=jnp.float32)          # @ bw^T
    c = c * m_ref[...]                                               # keep mask
    c = lax.dot_general(bh, c, (((0,), (0,)), ((), ())),
                        preferred_element_type=jnp.float32)          # bh^T @
    c = jnp.dot(c, bw, preferred_element_type=jnp.float32)           # @ bw
    o_ref[...] = c.astype(o_ref.dtype)


def jpeg_forward(encoded_and_cover):
    # TODO(synk): the reference JpegCompression does RGB->YUV and keeps a
    # per-channel zigzag count of coefficients; here every channel uses the
    # same low-frequency keep mask (works for arbitrary channel counts).
    # (bf16 matmul operands would halve MXU cycles on v6e/v7x; kept f32 here
    # as an accuracy choice.)
    enc, cover = encoded_and_cover
    n, c, h, w = enc.shape
    assert h % 8 == 0 and w % 8 == 0, "JPEG layer needs H, W multiples of 8"

    rows = n * c * h
    x2d = enc.reshape(rows, w)                      # free reshape, lane dim = W
    hb = _divisor_tile(rows, target=256)            # rows per grid step (mult of 8)
    assert rows % hb == 0
    grid = (rows // hb,)

    bh = jnp.asarray(_blockdiag_dct(hb // 8))       # (hb, hb)
    bw = jnp.asarray(_blockdiag_dct(w // 8))        # (w, w)
    mask = jnp.asarray(np.tile(_jpeg_keep_mask(), (hb // 8, w // 8)))  # (hb, w)

    out = pl.pallas_call(
        _jpeg_kernel,
        out_shape=jax.ShapeDtypeStruct(x2d.shape, enc.dtype),
        grid=grid,
        in_specs=[
            pl.BlockSpec((hb, w), lambda i: (i, 0)),
            pl.BlockSpec((hb, hb), lambda i: (0, 0)),   # constant block -> DMA'd once
            pl.BlockSpec((w, w), lambda i: (0, 0)),     # constant block -> DMA'd once
            pl.BlockSpec((hb, w), lambda i: (0, 0)),    # constant block -> DMA'd once
        ],
        out_specs=pl.BlockSpec((hb, w), lambda i: (i, 0)),
        compiler_params=pltpu.CompilerParams(dimension_semantics=("parallel",)),
    )(x2d, bh, bw, mask)
    return [out.reshape(enc.shape), cover]


# ------------------------------- Noiser -------------------------------------
class Noiser:
    """Pallas port of the HiDDeN Noiser: picks one noise layer at random
    (host-side, as in the reference) and applies it to [encoded, cover]."""

    def __init__(self, noise_layers, seed=0):
        self._rng = np.random.RandomState(seed)  # deterministic layer choice
        self.noise_layers = [identity_forward]
        for layer in noise_layers:
            if isinstance(layer, str):
                if layer == 'JpegPlaceholder':
                    self.noise_layers.append(jpeg_forward)
                elif layer == 'QuantizationPlaceholder':
                    self.noise_layers.append(quantization_forward)
                else:
                    raise ValueError(
                        'Wrong layer placeholder string in Noiser.__init__(). '
                        f'Expected "JpegPlaceholder" or "QuantizationPlaceholder" but got {layer} instead')
            else:
                self.noise_layers.append(layer)

    def __call__(self, encoded_and_cover):
        idx = self._rng.randint(len(self.noise_layers))
        return self.noise_layers[idx](encoded_and_cover)


# ------------------------- pure-JAX references -------------------------------
def _quant_reference(enc):
    x_min = jnp.min(enc)
    x_max = jnp.max(enc)
    t = (enc - x_min) * (255.0 / (x_max - x_min))
    z = jnp.zeros_like(t)
    for nn in range(_QUANT_N):
        w_n = ((-1.0) ** (nn + 1)) / (math.pi * (nn + 1))
        s_n = 2.0 * math.pi * (nn + 1)
        z = z + w_n * jnp.sin(t * s_n)
    r = t + z
    r_min = jnp.min(r)
    r_max = jnp.max(r)
    return (r - r_min) * ((x_max - x_min) / (r_max - r_min)) + x_min


def _jpeg_reference(enc):
    n, c, h, w = enc.shape
    d = jnp.asarray(_dct8_matrix())
    m = jnp.asarray(_jpeg_keep_mask())
    xb = enc.reshape(n, c, h // 8, 8, w // 8, 8)
    xb = jnp.transpose(xb, (0, 1, 2, 4, 3, 5))
    coeff = jnp.einsum('ij,...jk,lk->...il', d, xb, d) * m
    rec = jnp.einsum('ji,...jk,kl->...il', d, coeff, d)
    return jnp.transpose(rec, (0, 1, 2, 4, 3, 5)).reshape(n, c, h, w)


if __name__ == "__main__":
    key = jax.random.PRNGKey(0)
    k1, k2 = jax.random.split(key)
    encoded = jax.random.uniform(k1, (2, 4, 16, 16), jnp.float32, minval=-1.0, maxval=1.0)
    cover = jax.random.uniform(k2, (2, 4, 16, 16), jnp.float32, minval=-1.0, maxval=1.0)

    noiser = Noiser(['JpegPlaceholder', 'QuantizationPlaceholder'], seed=0)

    # Identity path (pass-through)
    out_id, cov = identity_forward([encoded, cover])
    jax.block_until_ready(out_id)
    assert out_id.shape == encoded.shape and cov.shape == cover.shape

    # Quantization Pallas path + numeric check vs pure-JAX reference
    out_q, _ = quantization_forward([encoded, cover])
    jax.block_until_ready(out_q)
    np.testing.assert_allclose(np.asarray(out_q), np.asarray(_quant_reference(encoded)),
                               atol=5e-3, rtol=0)

    # JPEG Pallas path + numeric check vs pure-JAX per-8x8 reference
    out_j, _ = jpeg_forward([encoded, cover])
    jax.block_until_ready(out_j)
    np.testing.assert_allclose(np.asarray(out_j), np.asarray(_jpeg_reference(encoded)),
                               atol=1e-3, rtol=0)

    # the actual Noiser forward: random layer selection (as in the reference)
    result = noiser([encoded, cover])
    jax.block_until_ready(result[0])
    assert result[0].shape == encoded.shape
    print("KERNEL_OK")
</pallas_src>

<mosaic_0001>
module attributes {stable_mosaic.version = 11 : i64} {
  func.func @kernel(%arg0: i32, %arg1: memref<2xf32, #tpu.memory_space<smem>>, %arg2: memref<4x512xf32, #tpu.memory_space<vmem>>, %arg3: memref<8x512xf32, #tpu.memory_space<vmem>>, %arg4: memref<8x512xf32, #tpu.memory_space<vmem>>) attributes {dimension_semantics = [#tpu.dimension_semantics<parallel>], iteration_bounds = array<i64: 1>, scalar_prefetch = 0 : i64, scratch_operands = 0 : i64, tpu.core_type = #tpu.core_type<tc>, window_params = [{transform_indices = @transform_0, window_bounds = array<i64: 2>}, {transform_indices = @transform_1, window_bounds = array<i64: 4, 512>}, {transform_indices = @transform_2, window_bounds = array<i64: 8, 512>}, {transform_indices = @transform_3, window_bounds = array<i64: 8, 512>}]} {
    %c0 = arith.constant 0 : index
    %c0_0 = arith.constant 0 : index
    %0 = vector.load %arg2[%c0, %c0_0] : memref<4x512xf32, #tpu.memory_space<vmem>>, vector<4x512xf32>
    %c0_1 = arith.constant 0 : index
    %1 = memref.load %arg1[%c0_1] : memref<2xf32, #tpu.memory_space<smem>>
    %2 = vector.broadcast %1 : f32 to vector<4x512xf32>
    %3 = arith.subf %0, %2 : vector<4x512xf32>
    %c1 = arith.constant 1 : index
    %4 = memref.load %arg1[%c1] : memref<2xf32, #tpu.memory_space<smem>>
    %5 = vector.broadcast %4 : f32 to vector<4x512xf32>
    %6 = arith.mulf %3, %5 : vector<4x512xf32>
    %cst = arith.constant 6.28318548 : f32
    %7 = vector.broadcast %cst : f32 to vector<4x512xf32>
    %8 = arith.mulf %7, %6 : vector<4x512xf32>
    %9 = math.sin %8 : vector<4x512xf32>
    %10 = math.cos %8 : vector<4x512xf32>
    %cst_2 = arith.constant 2.000000e+00 : f32
    %11 = vector.broadcast %cst_2 : f32 to vector<4x512xf32>
    %12 = arith.mulf %11, %10 : vector<4x512xf32>
    %cst_3 = arith.constant 0.000000e+00 : f32
    %13 = vector.broadcast %cst_3 : f32 to vector<4x512xf32>
    %cst_4 = arith.constant -0.318309873 : f32
    %14 = vector.broadcast %cst_4 : f32 to vector<4x512xf32>
    %15 = arith.mulf %14, %9 : vector<4x512xf32>
    %16 = arith.mulf %12, %9 : vector<4x512xf32>
    %17 = arith.subf %16, %13 : vector<4x512xf32>
    %cst_5 = arith.constant 0.159154937 : f32
    %18 = vector.broadcast %cst_5 : f32 to vector<4x512xf32>
    %19 = arith.mulf %18, %17 : vector<4x512xf32>
    %20 = arith.addf %15, %19 : vector<4x512xf32>
    %21 = arith.mulf %12, %17 : vector<4x512xf32>
    %22 = arith.subf %21, %9 : vector<4x512xf32>
    %cst_6 = arith.constant -0.106103294 : f32
    %23 = vector.broadcast %cst_6 : f32 to vector<4x512xf32>
    %24 = arith.mulf %23, %22 : vector<4x512xf32>
    %25 = arith.addf %20, %24 : vector<4x512xf32>
    %26 = arith.mulf %12, %22 : vector<4x512xf32>
    %27 = arith.subf %26, %17 : vector<4x512xf32>
    %cst_7 = arith.constant 0.0795774683 : f32
    %28 = vector.broadcast %cst_7 : f32 to vector<4x512xf32>
    %29 = arith.mulf %28, %27 : vector<4x512xf32>
    %30 = arith.addf %25, %29 : vector<4x512xf32>
    %31 = arith.mulf %12, %27 : vector<4x512xf32>
    %32 = arith.subf %31, %22 : vector<4x512xf32>
    %cst_8 = arith.constant -0.0636619776 : f32
    %33 = vector.broadcast %cst_8 : f32 to vector<4x512xf32>
    %34 = arith.mulf %33, %32 : vector<4x512xf32>
    %35 = arith.addf %30, %34 : vector<4x512xf32>
    %36 = arith.mulf %12, %32 : vector<4x512xf32>
    %37 = arith.subf %36, %27 : vector<4x512xf32>
    %cst_9 = arith.constant 0.0530516468 : f32
    %38 = vector.broadcast %cst_9 : f32 to vector<4x512xf32>
    %39 = arith.mulf %38, %37 : vector<4x512xf32>
    %40 = arith.addf %35, %39 : vector<4x512xf32>
    %41 = arith.mulf %12, %37 : vector<4x512xf32>
    %42 = arith.subf %41, %32 : vector<4x512xf32>
    %cst_10 = arith.constant -0.0454728417 : f32
    %43 = vector.broadcast %cst_10 : f32 to vector<4x512xf32>
    %44 = arith.mulf %43, %42 : vector<4x512xf32>
    %45 = arith.addf %40, %44 : vector<4x512xf32>
    %46 = arith.mulf %12, %42 : vector<4x512xf32>
    %47 = arith.subf %46, %37 : vector<4x512xf32>
    %cst_11 = arith.constant 0.0397887342 : f32
    %48 = vector.broadcast %cst_11 : f32 to vector<4x512xf32>
    %49 = arith.mulf %48, %47 : vector<4x512xf32>
    %50 = arith.addf %45, %49 : vector<4x512xf32>
    %51 = arith.mulf %12, %47 : vector<4x512xf32>
    %52 = arith.subf %51, %42 : vector<4x512xf32>
    %cst_12 = arith.constant -0.0353677645 : f32
    %53 = vector.broadcast %cst_12 : f32 to vector<4x512xf32>
    %54 = arith.mulf %53, %52 : vector<4x512xf32>
    %55 = arith.addf %50, %54 : vector<4x512xf32>
    %56 = arith.mulf %12, %52 : vector<4x512xf32>
    %57 = arith.subf %56, %47 : vector<4x512xf32>
    %cst_13 = arith.constant 0.0318309888 : f32
    %58 = vector.broadcast %cst_13 : f32 to vector<4x512xf32>
    %59 = arith.mulf %58, %57 : vector<4x512xf32>
    %60 = arith.addf %55, %59 : vector<4x512xf32>
    %61 = arith.addf %6, %60 : vector<4x512xf32>
    %cst_14 = arith.constant dense<0x7F800000> : vector<512xf32>
    %62 = vector.multi_reduction <minimumf>, %61, %cst_14 [0] : vector<4x512xf32> to vector<512xf32>
    %63 = vector.shape_cast %62 : vector<512xf32> to vector<1x512xf32>
    %64 = vector.shape_cast %63 : vector<1x512xf32> to vector<1x512xf32>
    %65 = vector.broadcast %64 : vector<1x512xf32> to vector<8x512xf32>
    %c0_15 = arith.constant 0 : index
    %c0_16 = arith.constant 0 : index
    %66 = vector.load %arg3[%c0_15, %c0_16] : memref<8x512xf32, #tpu.memory_space<vmem>>, vector<8x512xf32>
    tpu.vector_store %arg3[%c0_15, %c0_16], %65 {strides = array<i32>} : memref<8x512xf32, #tpu.memory_space<vmem>>, vector<8x512xf32>,
    %cst_17 = arith.constant dense<0xFF800000> : vector<512xf32>
    %67 = vector.multi_reduction <maximumf>, %61, %cst_17 [0] : vector<4x512xf32> to vector<512xf32>
    %68 = vector.shape_cast %67 : vector<512xf32> to vector<1x512xf32>
    %69 = vector.shape_cast %68 : vector<1x512xf32> to vector<1x512xf32>
    %70 = vector.broadcast %69 : vector<1x512xf32> to vector<8x512xf32>
    %c0_18 = arith.constant 0 : index
    %c0_19 = arith.constant 0 : index
    %71 = vector.load %arg4[%c0_18, %c0_19] : memref<8x512xf32, #tpu.memory_space<vmem>>, vector<8x512xf32>
    tpu.vector_store %arg4[%c0_18, %c0_19], %70 {strides = array<i32>} : memref<8x512xf32, #tpu.memory_space<vmem>>, vector<8x512xf32>,
    return
  }
  func.func @transform_0(%arg0: i32) -> i32 {
    %c0_i32 = arith.constant 0 : i32
    %c0_i32_0 = arith.constant 0 : i32
    return %c0_i32 : i32
  }
  func.func @transform_1(%arg0: i32) -> (i32, i32) {
    %c0_i32 = arith.constant 0 : i32
    %c0_i32_0 = arith.constant 0 : i32
    return %arg0, %c0_i32 : i32, i32
  }
  func.func @transform_2(%arg0: i32) -> (i32, i32) {
    %c0_i32 = arith.constant 0 : i32
    %c0_i32_0 = arith.constant 0 : i32
    return %arg0, %c0_i32 : i32, i32
  }
  func.func @transform_3(%arg0: i32) -> (i32, i32) {
    %c0_i32 = arith.constant 0 : i32
    %c0_i32_0 = arith.constant 0 : i32
    return %arg0, %c0_i32 : i32, i32
  }
}

</mosaic_0001>

<bundles_post_ra>
// kernel: tpu_custom_call.1
= control target key start
LH: loop header
LB: loop body
LE: loop exit
PB: predicated region body
PF: predicated region fallthrough
CT: control target
= control target key end

     0   :  { %9 = vsyncpa [#allocation5], 0  ;;  %s943_s0 = inlined_call_operand.hbm [shape: f32[2], index: 0, kind: input, shape index: {}]   ;;  %s944_s1 = inlined_call_operand.hbm [shape: f32[4,512], index: 1, kind: input, shape index: {}]   ;;  %s945_s2 = inlined_call_operand.hbm [shape: f32[8,512], index: 2, kind: output, shape index: {0}]   ;;  %s946_s3 = inlined_call_operand.hbm [shape: f32[8,512], index: 3, kind: output, shape index: {1}]  }
   0x1   :  { %10 = vsyncpa [#allocation3], 0 }
   0x2   :  { %11 = vsyncpa [#allocation4], 0 }
   0x3   :  { %12 = vsyncpa [#allocation9], 0  ;;  %s684_s14 = scalar_lea.hbm %s943_s0, 16 }
   0x4   :  { %p685_p0 = scmp.ne.s32.totalorder %s943_s0, %s684_s14  ;;  %p688_p1 = scmp.lt.u32.totalorder %s684_s14, %s943_s0 }
   0x6   :  { %p690_p2 = pnand %p688_p1, %p685_p0 }
   0x8   :  { %693 = shalt.err (!%p690_p2)
}
   0x9   :  { %s768_s19 = smov [#allocation2]   ;;  %s769_s22 = smov [#allocation6]  }
   0xa   :  { %20 = dma.hbm_to_smem %s943_s0, 16, %s768_s19, [#allocation5]  }
   0xb   :  { %s27_s23 = sshll.u32 %s769_s22, 4  ;;  %s694_s26 = scalar_lea.hbm %s944_s1, 256  ;;  %s28_s23 = int_to_ptr.vmem [resolvable:$true] %s27_s23 }
   0xc   :  { %p695_p3 = scmp.ne.s32.totalorder %s944_s1, %s694_s26  ;;  %p698_p4 = scmp.lt.u32.totalorder %s694_s26, %s944_s1 }
   0xe   :  { %p700_p5 = pnand %p698_p4, %p695_p3 }
  0x10   :  { %703 = shalt.err (!%p700_p5)
}
  0x11   :  { %s704_s4 = scalar_lea.vmem %s28_s23, 256  ;;  %p709_p7 = scmp.lt.s32.totalorder %s28_s23, %s28_s23 }
  0x12   :  { %p705_p6 = scmp.ne.s32.totalorder %s28_s23, %s704_s4  ;;  %p710_p8 = scmp.lt.s32.totalorder %s704_s4, %s704_s4 }
  0x14   :  { %p711_p9 = por %p710_p8, %p709_p7 }
  0x16   :  { %p712_p10 = pnand %p711_p9, %p705_p6 }
  0x18   :  { %715 = shalt.err (!%p712_p10)
}
  0x19   :  { %30 = dma.hbm_to_vmem [thread:$0]  %s944_s1, 256, %s28_s23, [#allocation3]  }
  0x1a   :  { %760 = dma.done.wait [#allocation5], 16  }
  0x1b   :  { %761 = vsyncadd [#allocation5], 4294967280 }
  0x1c   :  { %762 = dma.done.wait [#allocation3], 256  }
  0x1d   :  { %763 = vsyncadd [#allocation3], 4294967040 }
  0x1e   :  { %37 = sfence }
  0x1f   :  { %s40_s6 = sld [smem:[#allocation2]]  ;;  %s641_s7 = sld [smem:[#allocation2 + $0x1]]  ;;  %v38_v0 = vld [vmem:[#allocation6] sm:$0xff]  ;;  %v39_v1 = vld [vmem:[#allocation6 + $0x8] sm:$0xff]  ;;  %v770_v32 = vmov 683565275  }
  0x20   :  { %v771_v34 = vmov 2475754826   ;;  %v772_v36 = vmov 2131351028   ;;  %v773_v38 = vmov 2102212464  }
  0x21   :  { %v774_v40 = vmov 920167782   ;;  %v775_v48 = vmov 1326507024   ;;  %s776_s1 = smov [#allocation7]   ;;  %s777_s9 = smov [#allocation8]  }
  0x22   :  { %s617_s8 = sshll.u32 %s776_s1, 4  ;;  %s627_s10 = sshll.u32 %s777_s9, 4  ;;  %s618_s8 = int_to_ptr.vmem [resolvable:$true] %s617_s8  ;;  %s628_s10 = int_to_ptr.vmem [resolvable:$true] %s627_s10 }
  0x23   :  { %s716_s11 = scalar_lea.vmem %s618_s8, 512  ;;  %p721_p12 = scmp.lt.s32.totalorder %s618_s8, %s618_s8 }
  0x24   :  { %p717_p11 = scmp.ne.s32.totalorder %s618_s8, %s716_s11  ;;  %p722_p13 = scmp.lt.s32.totalorder %s716_s11, %s716_s11 }
  0x25   :  { %v41_v2 = vstv %s40_s6  ;;  %v45_v3 = vstv %s641_s7 }
  0x26   :  { %v42_v4 = vsub.f32 %v38_v0, %v41_v2  ;;  %v43_v5 = vsub.f32 %v39_v1, %v41_v2  ;;  %p723_p0 = por %p722_p13, %p721_p12 }
  0x28   :  { %v822_v6 = vmul.f32 %v45_v3, %v42_v4  ;;  %v824_v7 = vmul.f32 %v45_v3, %v43_v5  ;;  %p724_p1 = pnand %p723_p0, %p717_p11 }
  0x2a   :  { %v827_v8 = vmul.f32 6.2831855, %v822_v6  ;;  %v830_v9 = vmul.f32 6.2831855, %v824_v7 }
  0x2c   :  { %v50_v10 = vand.u32 2147483647, %v827_v8  ;;  %v53_v11 = vand.u32 2139095040, %v827_v8  ;;  %v154_v12 = vand.u32 2147483647, %v830_v9  ;;  %v157_v13 = vand.u32 2139095040, %v830_v9 }
  0x2d   :  { %vm52_vm14 = vcmp.lt.s32.totalorder %v827_v8, 0 }
  0x2e   :  { %v54_v14 = vshrl.u32 %v53_v11, 23  ;;  %v57_v15 = vand.u32 8388607, %v50_v10  ;;  %v158_v16 = vshrl.u32 %v157_v13, 23  ;;  %v161_v17 = vand.u32 8388607, %v154_v12 }
  0x2f   :  { %vm51_vm15 = vcmp.le.f32.partialorder %v50_v10, 0.7853982 }
  0x30   :  { %v642_v18 = vadd.s32 4294967169, %v54_v14  ;;  %v646_v19 = vadd.s32 4294967169, %v158_v16  ;;  %v58_v21 = vor.u32 8388608, %v57_v15  ;;  %v162_v22 = vor.u32 8388608, %v161_v17 }
  0x32   :  { %v60_v20 = vadd.s32 1, %v642_v18  ;;  %v164_v23 = vadd.s32 1, %v646_v19  ;;  %v840_v28 = vshll.u32 %v58_v21, 8  ;;  %v842_v30 = vshll.u32 %v162_v22, 8 }
  0x34   :  { %vm61_vm0 = vcmp.gt.s32.totalorder %v60_v20, 0  ;;  %vm165_vm1 = vcmp.gt.s32.totalorder %v164_v23, 0 }
  0x35   :  { %v62_v24 = vsel %vm61_vm0, %v60_v20, 0  ;;  %v166_v27 = vsel %vm165_vm1, %v164_v23, 0  ;;  %vm156_vm0 = vcmp.lt.s32.totalorder %v830_v9, 0  ;;  %vm155_vm1 = vcmp.le.f32.partialorder %v154_v12, 0.7853982 }
  0x36   :  { %v63_v25 = vshrl.u32 %v62_v24, 5  ;;  %v64_v26 = vand.u32 31, %v62_v24  ;;  %v168_v29 = vand.u32 31, %v166_v27  ;;  %v844_v42 = vshrl.u32 %v166_v27, 5 }
  0x38   :  { %v65_v31 = vsub.s32 32, %v64_v26  ;;  %v67_v33 = vshll.u32 %v770_v32, %v64_v26  ;;  %v70_v35 = vshll.u32 %v771_v34, %v64_v26  ;;  %v73_v37 = vshll.u32 %v772_v36, %v64_v26 }
  0x39   :  { %v76_v39 = vshll.u32 %v773_v38, %v64_v26  ;;  %v79_v41 = vshll.u32 %v774_v40, %v64_v26  ;;  %vm82_vm2 = vcmp.lt.s32.totalorder %v63_v25, 1  ;;  %vm83_vm3 = vcmp.lt.s32.totalorder %v63_v25, 2 }
  0x3a   :  { %v66_v43 = vshrl.u32 %v770_v32, %v65_v31  ;;  %v68_v44 = vshrl.u32 %v771_v34, %v65_v31  ;;  %v71_v45 = vshrl.u32 %v772_v36, %v65_v31  ;;  %v74_v46 = vshrl.u32 %v773_v38, %v65_v31 }
  0x3b   :  { %v77_v47 = vshrl.u32 %v774_v40, %v65_v31  ;;  %v80_v49 = vshrl.u32 %v775_v48, %v65_v31  ;;  %vm85_vm4 = vcmp.lt.s32.totalorder %v63_v25, 4  ;;  %v169_v53 = vsub.s32 32, %v168_v29 }
  0x3c   :  { %v69_v50 = vor.u32 %v68_v44, %v67_v33  ;;  %v72_v51 = vor.u32 %v71_v45, %v70_v35  ;;  %v75_v52 = vor.u32 %v74_v46, %v73_v37  ;;  %vm84_vm5 = vcmp.lt.s32.totalorder %v63_v25, 3 }
  0x3d   :  { %v78_v54 = vor.u32 %v77_v47, %v76_v39  ;;  %v81_v55 = vor.u32 %v80_v49, %v79_v41  ;;  %v171_v56 = vshll.u32 %v770_v32, %v168_v29  ;;  %v174_v0 = vshll.u32 %v771_v34, %v168_v29 }
  0x3e   :  { %v86_v57 = vsel %vm82_vm2, %v66_v43, %v69_v50  ;;  %v87_v58 = vsel %vm85_vm4, %v75_v52, 2102212464  ;;  %v90_v59 = vsel %vm82_vm2, %v69_v50, %v72_v51  ;;  %v94_v60 = vsel %vm82_vm2, %v72_v51, %v75_v52 }
  0x3f   :  { %v88_v61 = vsel %vm84_vm5, %v72_v51, %v87_v58  ;;  %v91_v62 = vsel %vm85_vm4, %v78_v54, 920167782  ;;  %v95_v63 = vsel %vm85_vm4, %v81_v55, 1326507024  ;;  %v170_v3 = vshrl.u32 %v770_v32, %v169_v53 }
  0x40   :  { %v92_v1 = vsel %vm84_vm5, %v75_v52, %v91_v62  ;;  %v96_v2 = vsel %vm84_vm5, %v78_v54, %v95_v63  ;;  %v172_v4 = vshrl.u32 %v771_v34, %v169_v53  ;;  %v89_v5 = vsel %vm83_vm3, %v86_v57, %v88_v61 }
  0x41   :  { %v93_v11 = vsel %vm83_vm3, %v90_v59, %v92_v1  ;;  %v97_v13 = vsel %vm83_vm3, %v94_v60, %v96_v2  ;;  %v175_v14 = vshrl.u32 %v772_v36, %v169_v53  ;;  %v177_v21 = vshll.u32 %v772_v36, %v168_v29 }
  0x42   :  { %v853_v15 = vmul.u32.u64.low %v840_v28, %v97_v13  ;;  %v854_v16 = vmul.u32.u64.high %v840_v28, %v97_v13, %v853_v15  ;;  %v857_v17 = vmul.u32.u64.low %v840_v28, %v93_v11  ;;  %v858_v18 = vmul.u32.u64.high %v840_v28, %v93_v11, %v857_v17 }
  0x43   :  { %v173_v19 = vor.u32 %v172_v4, %v171_v56  ;;  %v176_v20 = vor.u32 %v175_v14, %v174_v0  ;;  %v178_v22 = vshrl.u32 %v773_v38, %v169_v53  ;;  %v180_v23 = vshll.u32 %v773_v38, %v168_v29 }
  0x44   :  { %v181_v24 = vshrl.u32 %v774_v40, %v169_v53  ;;  %v183_v26 = vshll.u32 %v774_v40, %v168_v29  ;;  %v184_v27 = vshrl.u32 %v775_v48, %v169_v53  ;;  %v105_v25 = vmul.u32 %v840_v28, %v89_v5 }
  0x45   :  { %v179_v31 = vor.u32 %v178_v22, %v177_v21  ;;  %vm186_vm6 = vcmp.lt.s32.totalorder %v844_v42, 1  ;;  %vm187_vm7 = vcmp.lt.s32.totalorder %v844_v42, 2  ;;  %vm107_vm8 = vc.u32 %v854_v16, %v857_v17 }
  0x46   :  { %v108_v32 = vadd.s32 1, %v858_v18  ;;  %v182_v33 = vor.u32 %v181_v24, %v180_v23  ;;  %vm188_vm9 = vcmp.lt.s32.totalorder %v844_v42, 3  ;;  %v185_v34 = vor.u32 %v184_v27, %v183_v26 }
  0x47   :  { %vm189_vm10 = vcmp.lt.s32.totalorder %v844_v42, 4  ;;  %v190_v35 = vsel %vm186_vm6, %v170_v3, %v173_v19  ;;  %v194_v29 = vsel %vm186_vm6, %v173_v19, %v176_v20  ;;  %v198_v38 = vsel %vm186_vm6, %v176_v20, %v179_v31 }
  0x48   :  { %v109_v36 = vsel %vm107_vm8, %v108_v32, %v858_v18  ;;  %v191_v28 = vsel %vm189_vm10, %v179_v31, 2102212464  ;;  %v195_v37 = vsel %vm189_vm10, %v182_v33, 920167782  ;;  %v199_v43 = vsel %vm189_vm10, %v185_v34, 1326507024 }
  0x49   :  { %v110_v39 = vadd.s32 %v109_v36, %v105_v25  ;;  %v192_v40 = vsel %vm188_vm9, %v176_v20, %v191_v28  ;;  %v196_v41 = vsel %vm188_vm9, %v179_v31, %v195_v37  ;;  %v200_v46 = vsel %vm188_vm9, %v182_v33, %v199_v43 }
  0x4a   :  { %v193_v44 = vsel %vm187_vm7, %v190_v35, %v192_v40  ;;  %v197_v45 = vsel %vm187_vm7, %v194_v29, %v196_v41  ;;  %v201_v48 = vsel %vm187_vm7, %v198_v38, %v200_v46  ;;  %v106_v3 = vadd.s32 %v857_v17, %v854_v16 }
  0x4b   :  { %v111_v47 = vadd.s32 536870912, %v110_v39  ;;  %v875_v49 = vmul.u32.u64.low %v842_v30, %v197_v45  ;;  %v876_v50 = vmul.u32.u64.high %v842_v30, %v197_v45, %v875_v49  ;;  %v209_v54 = vmul.u32 %v842_v30, %v193_v44 }
  0x4c   :  { %v879_v51 = vmul.u32.u64.low %v842_v30, %v201_v48  ;;  %v880_v52 = vmul.u32.u64.high %v842_v30, %v201_v48, %v879_v51  ;;  %vm142_vm8 = vweird.f32 %v827_v8 }
  0x4d   :  { %v112_v53 = vshrl.u32 %v111_v47, 30  ;;  %v212_v56 = vadd.s32 1, %v876_v50 }
  0x4e   :  { %vm211_vm11 = vc.u32 %v880_v52, %v875_v49  ;;  %v210_v26 = vadd.s32 %v875_v49, %v880_v52 }
  0x4f   :  { %v113_v55 = vshll.u32 %v112_v53, 30  ;;  %v213_v42 = vsel %vm211_vm11, %v212_v56, %v876_v50  ;;  %v136_v16 = vsub.s32 4, %v112_v53 }
  0x50   :  { %v214_v58 = vadd.s32 %v213_v42, %v209_v54 }
  0x51   :  { %v114_v57 = vsub.s32 %v110_v39, %v113_v55  ;;  %v137_v36 = vsel %vm52_vm14, %v136_v16, %v112_v53 }
  0x52   :  { %v215_v60 = vadd.s32 536870912, %v214_v58  ;;  %v139_v40 = vsel %vm51_vm15, 0, %v137_v36 }
  0x53   :  { %v116_v59 = vsub.s32 0, %v114_v57  ;;  %v143_v46 = vadd.s32 3, %v139_v40  ;;  %v351_v50 = vand.u32 3, %v139_v40 }
  0x54   :  { %v216_v62 = vshrl.u32 %v215_v60, 30 }
  0x55   :  { %v643_v61 = vmin.u32 %v116_v59, %v114_v57  ;;  %v144_v49 = vand.u32 3, %v143_v46  ;;  %vm356_vm3 = vcmp.eq.s32.totalorder %v351_v50, 2  ;;  %vm353_vm5 = vcmp.eq.s32.totalorder %v351_v50, 0 }
  0x56   :  { %v217_v0 = vshll.u32 %v216_v62, 30  ;;  %v240_v45 = vsub.s32 4, %v216_v62  ;;  %vm352_vm7 = vcmp.lt.s32.totalorder %v351_v50, 2 }
  0x57   :  { %v118_v63 = vclz %v643_v61  ;;  %vm149_vm2 = vcmp.eq.s32.totalorder %v144_v49, 2  ;;  %vm146_vm4 = vcmp.eq.s32.totalorder %v144_v49, 0  ;;  %vm145_vm6 = vcmp.lt.s32.totalorder %v144_v49, 2 }
  0x58   :  { %v218_v2 = vsub.s32 %v214_v58, %v217_v0  ;;  %v241_v48 = vsel %vm156_vm0, %v240_v45, %v216_v62 }
  0x59   :  { %v644_v1 = vadd.s32 4294967294, %v118_v63  ;;  %v243_v53 = vsel %vm155_vm1, 0, %v241_v48 }
  0x5a   :  { %v220_v4 = vsub.s32 0, %v218_v2  ;;  %v454_v0 = vand.u32 3, %v243_v53 }
  0x5b   :  { %vm645_vm12 = vcmp.lt.s32.totalorder %v644_v1, 0 }
  0x5c   :  { %v121_v30 = vsel %vm645_vm12, 0, %v644_v1  ;;  %v647_v14 = vmin.u32 %v220_v4, %v218_v2  ;;  %vm459_vm10 = vcmp.eq.s32.totalorder %v454_v0, 2  ;;  %vm455_vm12 = vcmp.lt.s32.totalorder %v454_v0, 2 }
  0x5d   :  { %v122_v5 = vsub.s32 32, %v121_v30  ;;  %v123_v11 = vshll.u32 %v114_v57, %v121_v30  ;;  %v126_v13 = vsub.s32 4294967266, %v121_v30  ;;  %v247_v57 = vadd.s32 3, %v243_v53 }
  0x5e   :  { %v222_v19 = vclz %v647_v14 }
  0x5f   :  { %v124_v15 = vshrl.u32 %v106_v3, %v122_v5  ;;  %v127_v18 = vadd.s32 127, %v126_v13  ;;  %v248_v63 = vand.u32 3, %v247_v57 }
  0x60   :  { %v648_v22 = vadd.s32 4294967294, %v222_v19 }
  0x61   :  { %v125_v20 = vor.u32 %v124_v15, %v123_v11  ;;  %v128_v21 = vshll.u32 %v127_v18, 23  ;;  %vm253_vm9 = vcmp.eq.s32.totalorder %v248_v63, 2  ;;  %vm250_vm11 = vcmp.eq.s32.totalorder %v248_v63, 0 }
  0x62   :  { %vm649_vm13 = vcmp.lt.s32.totalorder %v648_v22, 0 }
  0x63   :  { %v129_v23 = vor.u32 4788187, %v128_v21  ;;  %v132_v24 = vcvt.s32.f32 %v125_v20  ;;  %v225_v17 = vsel %vm649_vm13, 0, %v648_v22  ;;  %vm456_vm13 = vcmp.eq.s32.totalorder %v454_v0, 0 }
  0x64   :  { %v226_v25 = vsub.s32 32, %v225_v17  ;;  %v227_v31 = vshll.u32 %v218_v2, %v225_v17  ;;  %v230_v32 = vsub.s32 4294967266, %v225_v17 }
  0x65   :  { %v130_v27 = vand.u32 2147483647, %v129_v23 }
  0x66   :  { %v228_v34 = vshrl.u32 %v210_v26, %v226_v25  ;;  %v231_v35 = vadd.s32 127, %v230_v32 }
  0x67   :  { %v133_v33 = vmul.f32 %v132_v24, %v130_v27 }
  0x68   :  { %v229_v28 = vor.u32 %v228_v34, %v227_v31  ;;  %v232_v37 = vshll.u32 %v231_v35, 23 }
  0x69   :  { %v134_v29 = vxor.u32 2147483648, %v133_v33 }
  0x6a   :  { %v233_v41 = vor.u32 4788187, %v232_v37  ;;  %v236_v43 = vcvt.s32.f32 %v229_v28 }
  0x6b   :  { %v135_v38 = vsel %vm52_vm14, %v134_v29, %v133_v33  ;;  %vm249_vm14 = vcmp.lt.s32.totalorder %v248_v63, 2 }
  0x6c   :  { %v138_v39 = vsel %vm51_vm15, %v827_v8, %v135_v38  ;;  %v234_v44 = vand.u32 2147483647, %v233_v41  ;;  %vm246_vm15 = vweird.f32 %v830_v9 }
  0x6d   :  { %676 = vcosq.f32 %v138_v39 }
  0x6e   :  { %678 = vsinq.f32 %v138_v39  ;;  %v237_v47 = vmul.f32 %v236_v43, %v234_v44 }
  0x70   :  { %v238_v10 = vxor.u32 2147483648, %v237_v47 }
  0x72   :  { %v239_v51 = vsel %vm156_vm0, %v238_v10, %v237_v47  ;;  %vm546_vm0 = vcmask 1043456  }
  0x73   :  { %v242_v52 = vsel %vm155_vm1, %v830_v9, %v239_v51 }
  0x74   :  { %680 = vcosq.f32 %v242_v52 }
  0x75   :  { %682 = vsinq.f32 %v242_v52 }
  0x77   :  { %v677_v54 = vpop.eup %676 }
  0x78   :  { %v679_v55 = vpop.eup %678  ;;  %v150_v56 = vxor.u32 2147483648, %v677_v54 }
  0x79   :  { %v147_v12 = vxor.u32 2147483648, %v679_v55 }
  0x7a   :  { %v151_v42 = vsel %vm149_vm2, %v150_v56, %v679_v55  ;;  %v358_v58 = vsel %vm356_vm3, %v150_v56, %v679_v55 }
  0x7b   :  { %v148_v59 = vsel %vm146_vm4, %v677_v54, %v147_v12  ;;  %v355_v60 = vsel %vm353_vm5, %v677_v54, %v147_v12 }
  0x7c   :  { %v152_v61 = vsel %vm145_vm6, %v148_v59, %v151_v42  ;;  %v359_v62 = vsel %vm352_vm7, %v355_v60, %v358_v58 }
  0x7d   :  { %v153_v1 = vsel %vm142_vm8, nan, %v152_v61  ;;  %v360_v2 = vsel %vm142_vm8, nan, %v359_v62 }
  0x7e   :  { %v897_v3 = vmul.f32 2.0, %v360_v2  ;;  %v681_v30 = vpop.eup %680  ;;  %v466_v4 = vmul.f32 -0.31830987, %v153_v1 }
  0x7f   :  { %v683_v11 = vpop.eup %682  ;;  %v254_v8 = vxor.u32 2147483648, %v681_v30 }
  0x80   :  { %v468_v5 = vmul.f32 %v897_v3, %v153_v1  ;;  %v251_v15 = vxor.u32 2147483648, %v683_v11 }
  0x81   :  { %v255_v18 = vsel %vm253_vm9, %v254_v8, %v683_v11  ;;  %v461_v19 = vsel %vm459_vm10, %v254_v8, %v683_v11 }
  0x82   :  { %v470_v13 = vmul.f32 0.15915494, %v468_v5  ;;  %v474_v14 = vmul.f32 %v468_v5, %v897_v3  ;;  %v252_v22 = vsel %vm250_vm11, %v681_v30, %v251_v15  ;;  %v458_v23 = vsel %vm456_vm13, %v681_v30, %v251_v15 }
  0x83   :  { %v256_v24 = vsel %vm249_vm14, %v252_v22, %v255_v18  ;;  %v462_v26 = vsel %vm455_vm12, %v458_v23, %v461_v19 }
  0x84   :  { %v472_v20 = vadd.f32 %v470_v13, %v466_v4  ;;  %v476_v21 = vsub.f32 %v474_v14, %v153_v1  ;;  %v257_v17 = vsel %vm246_vm15, nan, %v256_v24  ;;  %v463_v25 = vsel %vm246_vm15, nan, %v462_v26 }
  0x85   :  { %v465_v31 = vmul.f32 2.0, %v463_v25  ;;  %v467_v34 = vmul.f32 -0.31830987, %v257_v17 }
  0x86   :  { %v478_v27 = vmul.f32 -0.10610329, %v476_v21  ;;  %v482_v16 = vmul.f32 %v476_v21, %v897_v3 }
  0x87   :  { %v469_v35 = vmul.f32 %v465_v31, %v257_v17 }
  0x88   :  { %v480_v32 = vadd.f32 %v478_v27, %v472_v20  ;;  %v484_v33 = vsub.f32 %v482_v16, %v468_v5 }
  0x89   :  { %v471_v36 = vmul.f32 0.15915494, %v469_v35  ;;  %v475_v28 = vmul.f32 %v469_v35, %v465_v31 }
  0x8a   :  { %v486_v29 = vmul.f32 0.07957747, %v484_v33  ;;  %v490_v9 = vmul.f32 %v484_v33, %v897_v3 }
  0x8b   :  { %v473_v39 = vadd.f32 %v471_v36, %v467_v34  ;;  %v477_v40 = vsub.f32 %v475_v28, %v257_v17 }
  0x8c   :  { %v488_v37 = vadd.f32 %v486_v29, %v480_v32  ;;  %v492_v38 = vsub.f32 %v490_v9, %v476_v21 }
  0x8d   :  { %v479_v44 = vmul.f32 -0.10610329, %v477_v40  ;;  %v483_v45 = vmul.f32 %v477_v40, %v465_v31 }
  0x8e   :  { %v494_v41 = vmul.f32 -0.06366198, %v492_v38  ;;  %v498_v43 = vmul.f32 %v492_v38, %v897_v3 }
  0x8f   :  { %v481_v10 = vadd.f32 %v479_v44, %v473_v39  ;;  %v485_v48 = vsub.f32 %v483_v45, %v469_v35 }
  0x90   :  { %v496_v46 = vadd.f32 %v494_v41, %v488_v37  ;;  %v500_v47 = vsub.f32 %v498_v43, %v484_v33 }
  0x91   :  { %v487_v51 = vmul.f32 0.07957747, %v485_v48  ;;  %v491_v52 = vmul.f32 %v485_v48, %v465_v31 }
  0x92   :  { %v502_v49 = vmul.f32 0.053051647, %v500_v47  ;;  %v506_v50 = vmul.f32 %v500_v47, %v897_v3 }
  0x93   :  { %v489_v55 = vadd.f32 %v487_v51, %v481_v10  ;;  %v493_v56 = vsub.f32 %v491_v52, %v477_v40 }
  0x94   :  { %v504_v53 = vadd.f32 %v502_v49, %v496_v46  ;;  %v508_v54 = vsub.f32 %v506_v50, %v492_v38 }
  0x95   :  { %v495_v42 = vmul.f32 -0.06366198, %v493_v56  ;;  %v499_v58 = vmul.f32 %v493_v56, %v465_v31 }
  0x96   :  { %v510_v57 = vmul.f32 -0.04547284, %v508_v54  ;;  %v514_v12 = vmul.f32 %v508_v54, %v897_v3 }
  0x97   :  { %v497_v61 = vadd.f32 %v495_v42, %v489_v55  ;;  %v501_v62 = vsub.f32 %v499_v58, %v485_v48 }
  0x98   :  { %v512_v59 = vadd.f32 %v510_v57, %v504_v53  ;;  %v516_v60 = vsub.f32 %v514_v12, %v500_v47 }
  0x99   :  { %v503_v1 = vmul.f32 0.053051647, %v501_v62  ;;  %v507_v2 = vmul.f32 %v501_v62, %v465_v31 }
  0x9a   :  { %v518_v63 = vmul.f32 0.039788734, %v516_v60  ;;  %v522_v0 = vmul.f32 %v516_v60, %v897_v3 }
  0x9b   :  { %v505_v5 = vadd.f32 %v503_v1, %v497_v61  ;;  %v509_v11 = vsub.f32 %v507_v2, %v493_v56 }
  0x9c   :  { %v520_v30 = vadd.f32 %v518_v63, %v512_v59  ;;  %v524_v4 = vsub.f32 %v522_v0, %v508_v54 }
  0x9d   :  { %v511_v14 = vmul.f32 -0.04547284, %v509_v11  ;;  %v515_v15 = vmul.f32 %v509_v11, %v465_v31 }
  0x9e   :  { %v526_v8 = vmul.f32 -0.035367765, %v524_v4  ;;  %v530_v13 = vmul.f32 %v524_v4, %v897_v3 }
  0x9f   :  { %v513_v20 = vadd.f32 %v511_v14, %v505_v5  ;;  %v517_v21 = vsub.f32 %v515_v15, %v501_v62 }
  0xa0   :  { %v528_v18 = vadd.f32 %v526_v8, %v520_v30  ;;  %v532_v19 = vsub.f32 %v530_v13, %v516_v60 }
  0xa1   :  { %v519_v23 = vmul.f32 0.039788734, %v517_v21  ;;  %v523_v24 = vmul.f32 %v517_v21, %v465_v31 }
  0xa2   :  { %v534_v22 = vmul.f32 0.03183099, %v532_v19 }
  0xa3   :  { %v521_v27 = vadd.f32 %v519_v23, %v513_v20  ;;  %v525_v16 = vsub.f32 %v523_v24, %v509_v11 }
  0xa4   :  { %v536_v26 = vadd.f32 %v534_v22, %v528_v18 }
  0xa5   :  { %v527_v25 = vmul.f32 -0.035367765, %v525_v16  ;;  %v531_v32 = vmul.f32 %v525_v16, %v465_v31 }
  0xa6   :  { %v538_v17 = vadd.f32 %v536_v26, %v822_v6 }
  0xa7   :  { %v529_v29 = vadd.f32 %v527_v25, %v521_v27  ;;  %v533_v9 = vsub.f32 %v531_v32, %v517_v21 }
  0xa8   :  { %v547_v33 = vsel %vm546_vm0, %v538_v17, inf  ;;  %v542_v3 = vcombine.high %v538_v17, %v538_v17  ;;  %v579_v34 = vsel %vm546_vm0, %v538_v17, -inf }
  0xa9   :  { %v548_v35 = vrot.slane %v547_v33, 4  ;;  %v580_v36 = vrot.slane %v579_v34, 4  ;;  %v535_v40 = vmul.f32 0.03183099, %v533_v9 }
  0xaa   :  { %v554_v28 = vsel %vm546_vm0, %v542_v3, inf  ;;  %v586_v37 = vsel %vm546_vm0, %v542_v3, -inf }
  0xab   :  { %v549_v38 = vmin.f32 %v547_v33, %v548_v35  ;;  %v555_v39 = vrot.slane %v554_v28, 4  ;;  %v581_v41 = vmax.f32 %v579_v34, %v580_v36  ;;  %v587_v6 = vrot.slane %v586_v37, 4 }
  0xac   :  { %v537_v44 = vadd.f32 %v535_v40, %v529_v29 }
  0xad   :  { %v550_v43 = vrot.slane %v549_v38, 2  ;;  %v556_v31 = vmin.f32 %v554_v28, %v555_v39  ;;  %v582_v45 = vrot.slane %v581_v41, 2  ;;  %v588_v46 = vmax.f32 %v586_v37, %v587_v6 }
  0xae   :  { %v539_v48 = vadd.f32 %v537_v44, %v824_v7 }
  0xaf   :  { %v551_v47 = vmin.f32 %v549_v38, %v550_v43  ;;  %v557_v10 = vrot.slane %v556_v31, 2  ;;  %v583_v49 = vmax.f32 %v581_v41, %v582_v45  ;;  %v589_v50 = vrot.slane %v588_v46, 2 }
  0xb0   :  { %v561_v53 = vsel %vm546_vm0, %v539_v48, inf  ;;  %v543_v54 = vcombine.high %v539_v48, %v539_v48  ;;  %v593_v12 = vsel %vm546_vm0, %v539_v48, -inf }
  0xb1   :  { %v552_v51 = vrot.slane %v551_v47, 1  ;;  %v558_v52 = vmin.f32 %v556_v31, %v557_v10  ;;  %v562_v55 = vrot.slane %v561_v53, 4  ;;  %v584_v56 = vrot.slane %v583_v49, 1 }
  0xb2   :  { %v590_v57 = vmax.f32 %v588_v46, %v589_v50  ;;  %v568_v59 = vsel %vm546_vm0, %v543_v54, inf  ;;  %v594_v60 = vrot.slane %v593_v12, 4  ;;  %v600_v2 = vsel %vm546_vm0, %v543_v54, -inf }
  0xb3   :  { %v553_v42 = vmin.f32 %v551_v47, %v552_v51  ;;  %v559_v58 = vrot.slane %v558_v52, 1  ;;  %v563_v61 = vmin.f32 %v561_v53, %v562_v55  ;;  %v569_v62 = vrot.slane %v568_v59, 4 }
  0xb4   :  { %v585_v7 = vmax.f32 %v583_v49, %v584_v56  ;;  %v591_v63 = vrot.slane %v590_v57, 1  ;;  %v595_v1 = vmax.f32 %v593_v12, %v594_v60  ;;  %v601_v11 = vrot.slane %v600_v2, 4 }
  0xb5   :  { %575 = vst [vmem:[#allocation7] sm:$0xff] %v553_v42  ;;  %v560_v0 = vmin.f32 %v558_v52, %v559_v58  ;;  %v564_v30 = vrot.slane %v563_v61, 2  ;;  %v570_v4 = vmin.f32 %v568_v59, %v569_v62 }
  0xb6   :  { %607 = vst [vmem:[#allocation8] sm:$0xff] %v585_v7  ;;  %v592_v5 = vmax.f32 %v590_v57, %v591_v63  ;;  %v596_v8 = vrot.slane %v595_v1, 2  ;;  %v602_v15 = vmax.f32 %v600_v2, %v601_v11 }
  0xb7   :  { %576 = vst [vmem:[#allocation7 + $0x8] sm:$0xff] %v560_v0  ;;  %v565_v13 = vmin.f32 %v563_v61, %v564_v30  ;;  %v571_v14 = vrot.slane %v570_v4, 2 }
  0xb8   :  { %608 = vst [vmem:[#allocation8 + $0x8] sm:$0xff] %v592_v5  ;;  %v597_v18 = vmax.f32 %v595_v1, %v596_v8  ;;  %v603_v21 = vrot.slane %v602_v15, 2 }
  0xb9   :  { %v566_v19 = vrot.slane %v565_v13, 1  ;;  %v572_v20 = vmin.f32 %v570_v4, %v571_v14 }
  0xba   :  { %v598_v22 = vrot.slane %v597_v18, 1  ;;  %v604_v26 = vmax.f32 %v602_v15, %v603_v21 }
  0xbb   :  { %v567_v23 = vmin.f32 %v565_v13, %v566_v19  ;;  %v573_v24 = vrot.slane %v572_v20, 1 }
  0xbc   :  { %v599_v27 = vmax.f32 %v597_v18, %v598_v22  ;;  %v605_v17 = vrot.slane %v604_v26, 1 }
  0xbd   :  { %577 = vst [vmem:[#allocation7 + $0x10] sm:$0xff] %v567_v23  ;;  %v574_v16 = vmin.f32 %v572_v20, %v573_v24 }
  0xbe   :  { %609 = vst [vmem:[#allocation8 + $0x10] sm:$0xff] %v599_v27  ;;  %v606_v25 = vmax.f32 %v604_v26, %v605_v17 }
  0xbf   :  { %578 = vst [vmem:[#allocation7 + $0x18] sm:$0xff] %v574_v16 }
  0xc0   :  { %727 = shalt.err (!%p724_p1)
}
  0xc1   :  { %s728_s14 = scalar_lea.hbm %s945_s2, 512 }
  0xc2   :  { %p729_p2 = scmp.ne.s32.totalorder %s945_s2, %s728_s14  ;;  %p732_p3 = scmp.lt.u32.totalorder %s728_s14, %s945_s2 }
  0xc4   :  { %p734_p4 = pnand %p732_p3, %p729_p2 }
  0xc6   :  { %737 = shalt.err (!%p734_p4)
}
  0xc7   :  { %620 = dma.vmem_to_hbm [thread:$0]  %s618_s8, 512, %s945_s2, [#allocation4]   ;;  %610 = vst [vmem:[#allocation8 + $0x18] sm:$0xff] %v606_v25 }
  0xc8   :  { %s738_s21 = scalar_lea.vmem %s628_s10, 512  ;;  %p743_p6 = scmp.lt.s32.totalorder %s628_s10, %s628_s10 }
  0xc9   :  { %p739_p5 = scmp.ne.s32.totalorder %s628_s10, %s738_s21  ;;  %p744_p7 = scmp.lt.s32.totalorder %s738_s21, %s738_s21 }
  0xcb   :  { %p745_p8 = por %p744_p7, %p743_p6 }
  0xcd   :  { %p746_p9 = pnand %p745_p8, %p739_p5 }
  0xcf   :  { %749 = shalt.err (!%p746_p9)
}
  0xd0   :  { %s750_s24 = scalar_lea.hbm %s946_s3, 512 }
  0xd1   :  { %p751_p10 = scmp.ne.s32.totalorder %s946_s3, %s750_s24  ;;  %p754_p11 = scmp.lt.u32.totalorder %s750_s24, %s946_s3 }
  0xd3   :  { %p756_p12 = pnand %p754_p11, %p751_p10 }
  0xd5   :  { %759 = shalt.err (!%p756_p12)
}
  0xd6   :  { %630 = dma.vmem_to_hbm [thread:$0]  %s628_s10, 512, %s946_s3, [#allocation9]  }
  0xd7   :  { %764 = dma.done.wait [#allocation4], 512  }
  0xd8   :  { %765 = vsyncadd [#allocation4], 4294966784 }
  0xd9   :  { %766 = dma.done.wait [#allocation9], 512  }
  0xda   :  { %767 = vsyncadd [#allocation9], 4294966784 }
  0xdb   :  { %637 = vsyncpa [#allocation3], 1 }
  0xdc   :  { %638 = vsyncpa [#allocation4], 1 }
  0xdd   :  { %639 = vsyncpa [#allocation9], 1 }
  0xde   :  { %640 = vsyncpa [#allocation5], 1 }

</bundles_post_ra>
